<compile_context>
chip_gen: v7x
topology: tpu7x:2x2x1
jax: 0.10.0
libtpu: 0.0.40
codegen_flags: <defaults>
</compile_context>

<pallas_src>
import jax
import jax.numpy as jnp
import numpy as np
from jax.experimental import pallas as pl
from jax.experimental.pallas import tpu as pltpu

# ---------------------------------------------------------------------------
# Problem sizes
# ---------------------------------------------------------------------------
B = 2            # batch
C_IN = 4         # input channels
H = W = 16       # spatial
K = 3            # conv kernel
C_MID = 8        # conv output channels
N_CONCEPTS = 32  # model1 output ("c")
N_CLASSES = 16   # model2 output
HW = H * W

# Widened / flattened spatial layout used by the kernel.
W_PAD = W + 2                  # 18 : one zero column left/right
H_PAD = H + 3                  # 19 : one zero row on top, two at the bottom (slack for shifted windows)
FLAT = H_PAD * W_PAD           # 342: flattened padded image, per batch element
ROW_SLAB = H * W_PAD           # 288: flattened conv-output rows (widened by 2 pad cols)
POOL_LEN = FLAT + ROW_SLAB     # 630: joint [batch0 | junk | batch1] conv-output span
TAP_K = K * K * C_IN           # 36 : contraction depth of the single conv matmul
OUT_LANES = 128                # packed (c | y | 0) output lane width


# ---------------------------------------------------------------------------
# Pallas kernel: whole forward, single invocation, 4 MXU dots, 1 dense store.
# ---------------------------------------------------------------------------
def end2end_kernel(xt_ref, s_ref, wc_ref, bc_ref, w1_ref, wp_ref, bp_ref, out_ref):
    # Conv2d(3x3, pad=1): ONE K=36 MXU matmul against the tap-stacked operand
    # (bf16 in, f32 accumulate).  Result stays lane-dense: (C_MID, POOL_LEN).
    conv = jnp.dot(wc_ref[...], xt_ref[...], preferred_element_type=jnp.float32)

    # Bias + ReLU in f32 on the VPU (junk/pad columns are zeroed by the pool mask).
    act = jnp.maximum(conv + bc_ref[...], 0.0)               # (C_MID, POOL_LEN)

    # Masked global-average-pool + batch gather: contract the lane axes of the
    # lane-major pool mask (B, POOL_LEN) with act -> pooled (B, C_MID).
    pooled = jax.lax.dot_general(
        s_ref[...], act, (((1,), (1,)), ((), ())),
        preferred_element_type=jnp.float32)                   # (B, C_MID)

    # Heads: c0 = pooled @ W1 (b1 folded into bp); packed = [c | y | 0...].
    c0 = jnp.dot(pooled, w1_ref[...], preferred_element_type=jnp.float32)      # (B, 32)
    packed = jnp.dot(c0, wp_ref[...], preferred_element_type=jnp.float32) \
             + bp_ref[...]                                                     # (B, 128)

    # One lane-dense (B, 128) slab -> single unmasked store, single output DMA.
    out_ref[...] = packed.astype(out_ref.dtype)


# ---------------------------------------------------------------------------
# Wrapper / parameter packing
# ---------------------------------------------------------------------------
def build_pool_matrix():
    """(B, POOL_LEN) lane-major mask: 1/HW at each batch's valid output lanes."""
    s = np.zeros((B, POOL_LEN), np.float32)
    for b in range(B):
        base = b * FLAT
        for h in range(H):
            for w in range(W):
                s[b, base + h * W_PAD + w] = 1.0 / HW
    return jnp.asarray(s)


def prepare_input(x):
    """(B, C_IN, H, W) NCHW -> tap-stacked (TAP_K, POOL_LEN) bf16 conv operand.

    Zero-pad once, flatten so both batch elements sit back-to-back on the lane
    axis, then stack the 9 statically-shifted lane windows (one per 3x3 tap)
    on the sublane axis.  No im2col over the 256 spatial positions; the 2 junk
    pad columns per row are masked away by the pooling matrix in the kernel.
    """
    xpad = jnp.pad(x.astype(jnp.float32), ((0, 0), (0, 0), (1, 2), (1, 1)))
    xj = jnp.transpose(xpad.reshape(B, C_IN, FLAT), (1, 0, 2)).reshape(C_IN, B * FLAT)
    taps = []
    for t in range(K * K):
        start = (t // K) * W_PAD + (t % K)                 # static lane offset
        taps.append(xj[:, start:start + POOL_LEN])         # (C_IN, POOL_LEN)
    return jnp.concatenate(taps, axis=0).astype(jnp.bfloat16)   # (TAP_K, POOL_LEN)


def end2end_forward(x, kparams):
    wc2, bc_col, w1, wp, bp, pool_s = kparams
    xt = prepare_input(x)

    vmem = pl.BlockSpec(memory_space=pltpu.MemorySpace.VMEM)

    flops = 2 * (C_MID * TAP_K * POOL_LEN          # conv dot
                 + B * C_MID * POOL_LEN            # pool dot
                 + B * C_MID * N_CONCEPTS          # concept head
                 + B * N_CONCEPTS * OUT_LANES)     # packed output head
    bytes_accessed = (xt.size * 2 + pool_s.size * 4 + wc2.size * 2 + bc_col.size * 4
                      + w1.size * 4 + wp.size * 4 + bp.size * 4 + B * OUT_LANES * 4)

    packed = pl.pallas_call(
        end2end_kernel,
        out_shape=jax.ShapeDtypeStruct((B, OUT_LANES), jnp.float32),
        in_specs=[vmem] * 7,
        out_specs=vmem,
        compiler_params=pltpu.CompilerParams(
            # Let XLA fuse the pad/shift/stack producer of the x operand into
            # the pallas_call instead of running it as a separate dispatch.
            allow_input_fusion=[True, False, False, False, False, False, False]),
        cost_estimate=pl.CostEstimate(flops=flops, transcendentals=0,
                                      bytes_accessed=bytes_accessed),
    )(xt, pool_s, wc2, bc_col, w1, wp, bp)

    # Matches End2EndModel.forward: return (c, sec_model(c)).
    c = packed[:, :N_CONCEPTS]
    y = packed[:, N_CONCEPTS:N_CONCEPTS + N_CLASSES]
    return c, y


def init_reference_params(key):
    """Synthetic weights in PyTorch-like layouts (conv OIHW, linear (in,out))."""
    k0, k1, k2, k3, k4, k5 = jax.random.split(key, 6)
    wc = jax.random.normal(k0, (C_MID, C_IN, K, K), jnp.float32) * 0.1   # OIHW
    bc = jax.random.normal(k1, (C_MID,), jnp.float32) * 0.01
    w1 = jax.random.normal(k2, (C_MID, N_CONCEPTS), jnp.float32) * 0.1
    b1 = jax.random.normal(k3, (N_CONCEPTS,), jnp.float32) * 0.01
    w2 = jax.random.normal(k4, (N_CONCEPTS, N_CLASSES), jnp.float32) * 0.1
    b2 = jax.random.normal(k5, (N_CLASSES,), jnp.float32) * 0.01
    return wc, bc, w1, b1, w2, b2


def pack_kernel_params(ref_params):
    wc, bc, w1, b1, w2, b2 = ref_params
    # OIHW -> (C_MID, kh*kw*C_IN); column order matches the tap-stacked rows
    # (tap-major, channel-minor) of prepare_input.
    wc2 = jnp.transpose(wc, (0, 2, 3, 1)).reshape(C_MID, TAP_K).astype(jnp.bfloat16)
    bc_col = bc.reshape(C_MID, 1)
    # Output-packing head: Wp = [I_32 | W2 | 0], bp = [b1 | b1 @ W2 + b2 | 0],
    # so that packed = c0 @ Wp + bp == [c | y | 0] with c0 = pooled @ W1.
    wp = jnp.zeros((N_CONCEPTS, OUT_LANES), jnp.float32)
    wp = wp.at[:, :N_CONCEPTS].set(jnp.eye(N_CONCEPTS, dtype=jnp.float32))
    wp = wp.at[:, N_CONCEPTS:N_CONCEPTS + N_CLASSES].set(w2)
    bp = jnp.zeros((1, OUT_LANES), jnp.float32)
    bp = bp.at[0, :N_CONCEPTS].set(b1)
    bp = bp.at[0, N_CONCEPTS:N_CONCEPTS + N_CLASSES].set(b1 @ w2 + b2)
    return wc2, bc_col, w1, wp, bp, build_pool_matrix()


def reference_forward(x, ref_params):
    """Pure-JAX reference of the instantiated module (for a sanity check)."""
    wc, bc, w1, b1, w2, b2 = ref_params
    conv = jax.lax.conv_general_dilated(
        x, wc, (1, 1), ((1, 1), (1, 1)),
        dimension_numbers=("NCHW", "OIHW", "NCHW"))
    act = jnp.maximum(conv + bc[None, :, None, None], 0.0)
    pooled = act.mean(axis=(2, 3))                # (B, C_MID)
    c = pooled @ w1 + b1[None, :]
    y = c @ w2 + b2[None, :]
    return c, y


if __name__ == "__main__":
    key = jax.random.PRNGKey(0)
    kx, kp = jax.random.split(key)
    x = jax.random.normal(kx, (B, C_IN, H, W), jnp.float32)   # NCHW, PyTorch-style

    ref_params = init_reference_params(kp)
    kparams = pack_kernel_params(ref_params)

    c, y = jax.jit(end2end_forward)(x, kparams)
    jax.block_until_ready((c, y))

    assert c.shape == (B, N_CONCEPTS) and y.shape == (B, N_CLASSES)
    assert bool(jnp.all(jnp.isfinite(c))) and bool(jnp.all(jnp.isfinite(y)))

    # Structural correctness check against a plain-JAX forward (loose tolerance
    # budgets for bf16 conv-operand rounding through the MXU).
    c_ref, y_ref = reference_forward(x, ref_params)
    assert bool(jnp.allclose(c, c_ref, rtol=2e-2, atol=2e-2)), "concept mismatch"
    assert bool(jnp.allclose(y, y_ref, rtol=2e-2, atol=2e-2)), "logit mismatch"

    print("KERNEL_OK")
</pallas_src>

<mosaic_0001>
module attributes {stable_mosaic.version = 11 : i64} {
  func.func @end2end_kernel(%arg0: memref<36x630xbf16, #tpu.memory_space<vmem>>, %arg1: memref<2x630xf32, #tpu.memory_space<vmem>>, %arg2: memref<8x36xbf16, #tpu.memory_space<vmem>>, %arg3: memref<8x1xf32, #tpu.memory_space<vmem>>, %arg4: memref<8x32xf32, #tpu.memory_space<vmem>>, %arg5: memref<32x128xf32, #tpu.memory_space<vmem>>, %arg6: memref<1x128xf32, #tpu.memory_space<vmem>>, %arg7: memref<2x128xf32, #tpu.memory_space<vmem>>) attributes {dimension_semantics = [], scalar_prefetch = 0 : i64, scratch_operands = 0 : i64, tpu.core_type = #tpu.core_type<tc>} {
    %c0 = arith.constant 0 : index
    %c0_0 = arith.constant 0 : index
    %0 = vector.load %arg2[%c0, %c0_0] : memref<8x36xbf16, #tpu.memory_space<vmem>>, vector<8x36xbf16>
    %c0_1 = arith.constant 0 : index
    %c0_2 = arith.constant 0 : index
    %1 = vector.load %arg0[%c0_1, %c0_2] : memref<36x630xbf16, #tpu.memory_space<vmem>>, vector<36x630xbf16>
    %cst = arith.constant dense<0.000000e+00> : vector<8x630xf32>
    %2 = tpu.matmul %0, %1, %cst {dimension_numbers = #tpu.dot_dimension_numbers<[1], [0], [0], [1], [0, 0, 1, 1], [], []>} : vector<8x36xbf16>, vector<36x630xbf16>, vector<8x630xf32> -> vector<8x630xf32>
    %c0_3 = arith.constant 0 : index
    %c0_4 = arith.constant 0 : index
    %3 = vector.load %arg3[%c0_3, %c0_4] : memref<8x1xf32, #tpu.memory_space<vmem>>, vector<8x1xf32>
    %4 = vector.broadcast %3 : vector<8x1xf32> to vector<8x630xf32>
    %5 = arith.addf %2, %4 : vector<8x630xf32>
    %cst_5 = arith.constant 0.000000e+00 : f32
    %6 = vector.broadcast %cst_5 : f32 to vector<8x630xf32>
    %7 = arith.maximumf %5, %6 : vector<8x630xf32>
    %c0_6 = arith.constant 0 : index
    %c0_7 = arith.constant 0 : index
    %8 = vector.load %arg1[%c0_6, %c0_7] : memref<2x630xf32, #tpu.memory_space<vmem>>, vector<2x630xf32>
    %cst_8 = arith.constant dense<0.000000e+00> : vector<2x8xf32>
    %9 = tpu.matmul %8, %7, %cst_8 {dimension_numbers = #tpu.dot_dimension_numbers<[1], [1], [0], [0], [0, 0, 1, 0], [], []>} : vector<2x630xf32>, vector<8x630xf32>, vector<2x8xf32> -> vector<2x8xf32>
    %c0_9 = arith.constant 0 : index
    %c0_10 = arith.constant 0 : index
    %10 = vector.load %arg4[%c0_9, %c0_10] : memref<8x32xf32, #tpu.memory_space<vmem>>, vector<8x32xf32>
    %cst_11 = arith.constant dense<0.000000e+00> : vector<2x32xf32>
    %11 = tpu.matmul %9, %10, %cst_11 {dimension_numbers = #tpu.dot_dimension_numbers<[1], [0], [0], [1], [0, 0, 1, 1], [], []>} : vector<2x8xf32>, vector<8x32xf32>, vector<2x32xf32> -> vector<2x32xf32>
    %c0_12 = arith.constant 0 : index
    %c0_13 = arith.constant 0 : index
    %12 = vector.load %arg5[%c0_12, %c0_13] : memref<32x128xf32, #tpu.memory_space<vmem>>, vector<32x128xf32>
    %cst_14 = arith.constant dense<0.000000e+00> : vector<2x128xf32>
    %13 = tpu.matmul %11, %12, %cst_14 {dimension_numbers = #tpu.dot_dimension_numbers<[1], [0], [0], [1], [0, 0, 1, 1], [], []>} : vector<2x32xf32>, vector<32x128xf32>, vector<2x128xf32> -> vector<2x128xf32>
    %c0_15 = arith.constant 0 : index
    %c0_16 = arith.constant 0 : index
    %14 = vector.load %arg6[%c0_15, %c0_16] : memref<1x128xf32, #tpu.memory_space<vmem>>, vector<1x128xf32>
    %15 = vector.broadcast %14 : vector<1x128xf32> to vector<2x128xf32>
    %16 = arith.addf %13, %15 : vector<2x128xf32>
    %c0_17 = arith.constant 0 : index
    %c0_18 = arith.constant 0 : index
    %17 = vector.load %arg7[%c0_17, %c0_18] : memref<2x128xf32, #tpu.memory_space<vmem>>, vector<2x128xf32>
    tpu.vector_store %arg7[%c0_17, %c0_18], %16 {strides = array<i32>} : memref<2x128xf32, #tpu.memory_space<vmem>>, vector<2x128xf32>,
    return
  }
}

</mosaic_0001>

<bundles_post_ra>
// kernel: end2end_forward.1
= control target key start
LH: loop header
LB: loop body
LE: loop exit
PB: predicated region body
PF: predicated region fallthrough
CT: control target
= control target key end

     0   :  { %v780_v1 = vmov 0   ;;  %vm118_vm0 = vcmask 1041408   ;;  %vm114_vm1 = vcmask 293888   ;;  %v781_v20 = vmov 0.0   ;;  %s918_s0 = inlined_call_operand.vmem [shape: bf16[36,630], index: 0, kind: input, shape index: {}]   ;;  %s919_s3 = inlined_call_operand.vmem [shape: f32[8,1], index: 3, kind: input, shape index: {}]   ;;  %s920_s2 = inlined_call_operand.vmem [shape: bf16[8,36], index: 2, kind: input, shape index: {}]   ;;  %s921_s1 = inlined_call_operand.vmem [shape: f32[2,630], index: 1, kind: input, shape index: {}]   ;;  %s922_s4 = inlined_call_operand.vmem [shape: f32[8,32], index: 4, kind: input, shape index: {}]   ;;  %s923_s5 = inlined_call_operand.vmem [shape: f32[32,128], index: 5, kind: input, shape index: {}]   ;;  %s924_s6 = inlined_call_operand.vmem [shape: f32[1,128], index: 6, kind: input, shape index: {}]   ;;  %s925_s7 = inlined_call_operand.vmem [shape: f32[2,128], index: 7, kind: output, shape index: {}]  }
   0x1   :  { %v760_v0 = vld [vmem:[%s918_s0 + $0x4] ss:$20 sps:$4 sm:$0xff]   ;;  %166 = vmatprep.mubr.bf16.mxu0 %v780_v1  ;;  %207 = vmatprep.mubr.bf16.mxu1 %v780_v1  ;;  %v762_v2 = vld [vmem:[%s918_s0 + $0xc] ss:$20 sps:$4 sm:$0xff]   ;;  %v765_v4 = vld [vmem:[%s918_s0 + $0x8] ss:$20 sps:$4 sm:$0xff]   ;;  %v269_v26 = vlaneseq }
   0x2   :  { %759 = vset.pattern.permute.xlu0 %v780_v1  ;;  %134 = vmatprep.subr.bf16.mxu0 %v760_v0  ;;  %v764_v3 = vld [vmem:[%s918_s0] ss:$20 sps:$4 sm:$0xff]   ;;  %v770_v7 = vld [vmem:[%s918_s0 + $0x28] ss:$20 sps:$4 sm:$0xff]   ;;  %v771_v8 = vld [vmem:[%s918_s0 + $0x30] ss:$20 sps:$4 sm:$0xff]  }
   0x3   :  { %175 = vmatprep.subr.bf16.mxu1 %v762_v2  ;;  %v766_v5 = vld [vmem:[%s918_s0 + $0x2c] ss:$20 sps:$4 sm:$0xff]   ;;  %135 = vmatpush1.bf16.msra.mxu0 %v764_v3  ;;  %v768_v6 = vld [vmem:[%s918_s0 + $0x34] ss:$20 sps:$4 sm:$0xff]   ;;  %v41_v10 = vld [vmem:[%s918_s0 + $0x58] sm:$0x33] }
   0x4   :  { %176 = vmatpush1.bf16.msra.mxu1 %v765_v4  ;;  %136 = vmatprep.subr.bf16.mxu0 %v766_v5  ;;  %v40_v9 = vld [vmem:[%s918_s0 + $0x50] sm:$0x33]  ;;  %v687_v12 = vcombine.high %v41_v10, %v41_v10  ;;  %v686_v14 = vcombine.low %v41_v10, %v41_v10  ;;  %v43_v17 = vld [vmem:[%s919_s3] sm:$0xff]  ;;  %v777_v21 = vld [vmem:[%s918_s0 + $0x38] ss:$20 sps:$4 sm:$0xff]   ;;  %vm782_vm2 = vmmov 0  }
   0x5   :  { %177 = vmatprep.subr.bf16.mxu1 %v768_v6  ;;  %v685_v11 = vcombine.high %v40_v9, %v40_v9  ;;  %v684_v13 = vcombine.low %v40_v9, %v40_v9  ;;  %46 = vperm.xlu0 %759, %v43_v17   ;;  %v27_v18 = vld [vmem:[%s920_s2] sm:$0xf]  ;;  %v776_v19 = vld [vmem:[%s918_s0 + $0x10] ss:$20 sps:$4 sm:$0xff]   ;;  %v783_v24 = vmov 1983009808  }
   0x6   :  { %v126_v16 = vsel %vm118_vm0, %v686_v14, 0  ;;  %v778_v22 = vld [vmem:[%s918_s0 + $0x60] ss:$0 sps:$4 sm:$0x33]   ;;  %v267_v25 = vunpack.c.l.s4 %v783_v24  ;;  %v270_v28 = vshrl.u32 %v269_v26, 7  ;;  %vm293_vm3 = vcmask 965632  }
   0x7   :  { %137 = vmatpush1.bf16.msra.mxu0 %v770_v7  ;;  %v120_v15 = vsel %vm118_vm0, %v684_v13, 0  ;;  %v132_v23 = vsel %vm118_vm0, %v778_v22, 0  ;;  %v261_v30 = vld [vmem:[%s921_s1] sm:$0xff]  ;;  %v784_v61 = vmov 0.0|0.0   ;;  %v585_v63 = vld [vmem:[%s923_s5 + $0x8] sm:$0xff]  ;;  %v586_v0 = vld [vmem:[%s923_s5 + $0x10] sm:$0xff] }
   0x8   :  { %178 = vmatpush1.bf16.msra.mxu1 %v771_v8  ;;  %689 = vmatprep.subr.msk.bf16.mxu0 %vm118_vm0, %v685_v11  ;;  %v268_v27 = vunpack.c.0.s8 %v267_v25  ;;  %v265_v33 = vcombine.high %v261_v30, %v261_v30  ;;  %v509_v35 = vld [vmem:[%s922_s4] sm:$0xff]  ;;  %v694_v60 = vld.sshfl [vmem:[%s921_s1 + $0x8] sm:$0x3 pattern:$0x76325410]  ;;  %v587_v2 = vld [vmem:[%s923_s5 + $0x18] sm:$0xff] }
   0x9   :  { %691 = vmatprep.subr.msk.bf16.mxu1 %vm118_vm0, %v687_v12  ;;  %v584_v62 = vld [vmem:[%s923_s5] sm:$0xff]  ;;  %v748_v3 = vpack.c.bf16 %v587_v2, %v586_v0  ;;  %vm510_vm4 = vcmask 64512   ;;  %vm595_vm5 = vcmask 261120  }
   0xa   :  { %v271_v29 = vsub.s32 %v268_v27, %v270_v28  ;;  %v745_v1 = vpack.c.bf16 %v585_v63, %v584_v62  ;;  %v698_v8 = vld [vmem:[%s924_s6] ss:$0 sm:$0xff] }
   0xb   :  { %139 = vmatpush1.bf16.msra.mxu0 %v120_v15 }
   0xc   :  { %180 = vmatpush1.bf16.msra.mxu1 %v126_v16  ;;  %713 = vmatprep.subr.bf16.mxu0 %v781_v20  ;;  %v272_v31 = vrot.slane %v261_v30, %v271_v29  ;;  %v279_v34 = vrot.slane %v265_v33, %v271_v29 }
   0xe   :  { %690 = vmatmul.mubr.msk.bf16.vlgmr.msra.gmra.mrb[0].mxu0 %vm114_vm1, %v27_v18  ;;  %v280_v32 = vcombine.high %v272_v31, %v272_v31  ;;  %v281_v52 = vcombine.high %v279_v34, %v279_v34 }
   0xf   :  { %692 = vmatmul.mubr.msk.bf16.vlgmr.msra.gmra.mrb[0].mxu1 %vm114_vm1, %v27_v18  ;;  %714 = vmatpush3.bf16.msra.mxu0 %v776_v19 }
  0x10   :  { %719 = vmatprep.mubr.msk.bf16.mxu0 %vm782_vm2, %v781_v20  ;;  %715 = vmatprep.subr.bf16.mxu0 %v781_v20 }
  0x11   :  { %363 = vmatprep.mubr.f32.mxu1 %v280_v32 }
  0x13   :  { %716 = vmatpush3.bf16.msra.mxu0 %v777_v21 }
  0x14   :  { %717 = vmatprep.subr.bf16.mxu0 %v781_v20 }
  0x17   :  { %718 = vmatpush3.bf16.msra.mxu0 %v132_v23 }
  0x18   :  { %728 = vmatprep.subr.mxu0 %v781_v20 }
  0x1a   :  { %720 = vmatmul.mubr.msk.bf16.vlgmr.msra.gmra.mrb[4].mxu0 %vm114_vm1, %v27_v18 }
  0x1b   :  { %730 = vmatprep.mubr.msk.f32.mxu0 %vm782_vm2, %v781_v20  ;;  %729 = vmatpush3.msra.mxu0 %v509_v35 }
  0x84   :  { %v47_v36 = vpop.permute.xlu0 %46 }
  0xe1   :  { %v168_v37 = vpop.f32.mrb[0].mxu0 }
  0xe2   :  { %v209_v38 = vpop.f32.mrb[0].mxu1  ;;  %v169_v39 = vadd.f32 %v168_v37, %v47_v36  ;;  %v170_v40 = vpop.f32.mrb[1].mxu0 }
  0xe3   :  { %v211_v41 = vpop.f32.mrb[1].mxu1  ;;  %v171_v42 = vadd.f32 %v170_v40, %v47_v36  ;;  %v172_v44 = vpop.f32.mrb[2].mxu0  ;;  %v210_v50 = vadd.f32 %v209_v38, %v47_v36 }
  0xe4   :  { %v212_v43 = vadd.f32 %v211_v41, %v47_v36  ;;  %v213_v45 = vpop.f32.mrb[2].mxu1  ;;  %v173_v46 = vpop.f32.mrb[3].mxu0  ;;  %v256_v49 = vmax.f32 %v169_v39, 0.0 }
  0xe5   :  { %v214_v47 = vpop.f32.mrb[3].mxu1  ;;  %v257_v48 = vmax.f32 %v171_v42, 0.0  ;;  %v258_v53 = vmax.f32 %v210_v50, 0.0 }
  0xe6   :  { %v259_v51 = vmax.f32 %v212_v43, 0.0 }
  0xe7   :  { %299 = vmatprep.subr.mxu1 %v257_v48 }
  0xe8   :  { %300 = vmatpush1.xpose.msra.mxu1 %v256_v49 }
  0xe9   :  { %369 = vmatprep.subr.mxu1 %v259_v51 }
  0xeb   :  { %364 = vmatmul.mubr.f32.vlgmr.msra.gmra.mrb[4].mxu1 %v272_v31 }
  0xec   :  { %370 = vmatpush1.xpose.msra.mxu1 %v258_v53  ;;  %433 = vmatprep.mubr.f32.mxu1 %v281_v52 }
  0xed   :  { %v250_v54 = vpop.f32.mrb[4].mxu0  ;;  %723 = vmatprep.subr.mxu1 %v781_v20 }
  0xee   :  { %v251_v55 = vadd.f32 %v250_v54, %v47_v36  ;;  %v721_v56 = vpop.f32.mrb[5].mxu0 }
  0xef   :  { %v253_v57 = vpop.f32.mrb[6].mxu0 }
  0xf0   :  { %v260_v58 = vmax.f32 %v251_v55, 0.0  ;;  %v722_v59 = vpop.f32.mrb[7].mxu0 }
  0xf3   :  { %434 = vmatmul.mubr.f32.vlgmr.msra.gmra.mrb[4].mxu1 %v279_v34 }
  0xf4   :  { %724 = vmatpush3.xpose.msk.msra.mxu1 %vm293_vm3, %v260_v58  ;;  %725 = vmatprep.mubr.msk.f32.mxu1 %vm782_vm2, %v781_v20 }
  0xf5   :  { %744 = vmatprep.subr.bf16.mxu1 %v784_v61 }
  0xfb   :  { %726 = vmatmul.mubr.msk.f32.vlgmr.msra.gmra.mrb[4].mxu1 %vm293_vm3, %v694_v60 }
  0xfc   :  { %741 = vmatprep.mubr.msk.f32.mxu1 %vm782_vm2, %v781_v20  ;;  %746 = vmatpush3.bf16.msra.mxu1 %v745_v1 }
  0xfd   :  { %747 = vmatprep.subr.bf16.mxu1 %v784_v61 }
 0x100   :  { %749 = vmatpush3.bf16.msra.mxu1 %v748_v3 }
 0x1ce   :  { %v505_v4 = vpop.f32.mrb[4].mxu1 }
 0x1cf   :  { %v727_v5 = vpop.f32.mrb[5].mxu1  ;;  %731 = vmatmul.mubr.msk.f32.vlgmr.msra.gmra.mrb[8].mxu0 %vm510_vm4, %v505_v4 }
 0x2a2   :  { %v580_v6 = vpop.f32.mrb[8].mxu0 }
 0x2a3   :  { %v732_v7 = vpop.f32.mrb[9].mxu0  ;;  %742 = vmatmul.mubr.msk.f32.vlgmr.msra.gmra.mrb[6].mxu1 %vm595_vm5, %v580_v6 }
 0x376   :  { %v665_v9 = vpop.f32.mrb[6].mxu1 }
 0x377   :  { %v666_v10 = vadd.f32 %v698_v8, %v665_v9  ;;  %v743_v11 = vpop.f32.mrb[7].mxu1 }
 0x379   :  { %669 = vst [vmem:[%s925_s7] sm:$0x3] %v666_v10 }

</bundles_post_ra>
